<compile_context>
chip_gen: v7x
topology: tpu7x:2x2x1
jax: 0.10.0
libtpu: 0.0.40
codegen_flags: <defaults>
</compile_context>

<pallas_src>
import functools

import jax
import jax.numpy as jnp
from jax.experimental import pallas as pl
from jax.experimental.pallas import tpu as pltpu


def attention_head_kernel(x_ref, wqkv_ref, o_ref, *, scale, head_size):
    B, T, C = x_ref.shape
    H = head_size

    # Fold batch into M and fuse the three projections: one (B*T, C) @ (C, 3H)
    # MXU matmul instead of 3*B tiny (T, C) @ (C, H) matmuls.
    x2d = x_ref[...].reshape(B * T, C)
    qkv = jnp.dot(x2d, wqkv_ref[...], preferred_element_type=jnp.float32)
    qkv = qkv.reshape(B, T, 3 * H)

    # Fold the C**-0.5 score scale into q (B*T*H elements, not B*T*T scores).
    q = qkv[:, :, 0:H] * scale
    k = qkv[:, :, H:2 * H]
    v = qkv[:, :, 2 * H:3 * H]

    # Attention scores: contract on the head dim directly (no explicit k.T).
    wei = jnp.einsum("btd,bsd->bts", q, k,
                     preferred_element_type=jnp.float32)          # (B, T, T)

    # Causal mask generated in-kernel (replaces the f32 tril input + its DMA).
    row = jax.lax.broadcasted_iota(jnp.int32, (T, T), 0)
    col = jax.lax.broadcasted_iota(jnp.int32, (T, T), 1)
    wei = jnp.where((row >= col)[None, :, :], wei, -jnp.inf)

    # Numerically stable softmax. Normalization is deferred: apply the
    # reciprocal of the row-sum to the (B, T, H) output instead of the
    # (B, T, T) probabilities; reciprocal runs on the otherwise-idle EUP.
    wei_max = jnp.max(wei, axis=-1, keepdims=True)
    p = jnp.exp(wei - wei_max)                                    # (B, T, T)
    denom = jnp.sum(p, axis=-1, keepdims=True)                    # (B, T, 1)

    # TODO(synk): train-mode dropout on the attention weights
    # (pltpu.prng_seed / pltpu.prng_random_bits) not implemented; nn.Dropout
    # is the identity in eval mode.

    out = jnp.einsum("bts,bsd->btd", p, v,
                     preferred_element_type=jnp.float32)          # (B, T, H)
    out = out * pl.reciprocal(denom, approx=True)
    o_ref[...] = out.astype(o_ref.dtype)


def attention_head(x, wk, wq, wv):
    """x: (B, T, C) f32; wk/wq/wv: (C, H) f32 (transpose of nn.Linear.weight)."""
    B, T, C = x.shape
    H = wk.shape[1]
    scale = float(C) ** -0.5

    # Fused projection weight, column order [q | k | v] -> (C, 3H).
    w_qkv = jnp.concatenate([wq, wk, wv], axis=1)

    kernel = functools.partial(attention_head_kernel, scale=scale, head_size=H)

    # All operands are tiny, so run a single kernel invocation (grid=()) with
    # whole arrays resident in VMEM; no tiling / pipelining needed.
    return pl.pallas_call(
        kernel,
        out_shape=jax.ShapeDtypeStruct((B, T, H), jnp.float32),
        in_specs=[
            pl.BlockSpec(memory_space=pltpu.MemorySpace.VMEM),   # x
            pl.BlockSpec(memory_space=pltpu.MemorySpace.VMEM),   # fused W_qkv
        ],
        out_specs=pl.BlockSpec(memory_space=pltpu.MemorySpace.VMEM),
    )(x, w_qkv)


def reference(x, wk, wq, wv, tril):
    B, T, C = x.shape
    k = x @ wk
    q = x @ wq
    v = x @ wv
    wei = jnp.einsum("btd,bsd->bts", q, k) * (C ** -0.5)
    wei = jnp.where(tril[:T, :T] == 0.0, -jnp.inf, wei)
    wei = jax.nn.softmax(wei, axis=-1)
    return wei @ v


if __name__ == "__main__":
    # small shapes consistent with the module: n_embed=32, 4 heads -> head_size=8
    B, T = 2, 8
    n_embed, head_size, block_size = 32, 8, 8

    key = jax.random.PRNGKey(0)
    kx, kk, kq, kv = jax.random.split(key, 4)

    x = jax.random.normal(kx, (B, T, n_embed), dtype=jnp.float32)

    # deterministic init, matching nn.Linear's U(-1/sqrt(fan_in), 1/sqrt(fan_in))
    bound = 1.0 / (n_embed ** 0.5)
    wk = jax.random.uniform(kk, (n_embed, head_size), jnp.float32, -bound, bound)
    wq = jax.random.uniform(kq, (n_embed, head_size), jnp.float32, -bound, bound)
    wv = jax.random.uniform(kv, (n_embed, head_size), jnp.float32, -bound, bound)

    tril = jnp.tril(jnp.ones((block_size, block_size), dtype=jnp.float32))

    out = attention_head(x, wk, wq, wv)
    out = jax.block_until_ready(out)

    ref = reference(x, wk, wq, wv, tril)
    assert out.shape == (B, T, head_size)
    # Tolerance accounts for the approximate EUP reciprocal (~1e-4 relative)
    # used for the softmax normalization; everything else is exact f32.
    assert jnp.allclose(out, ref, atol=2e-3, rtol=2e-3), "mismatch vs reference"

    print("KERNEL_OK")
</pallas_src>

<mosaic_0001>
module attributes {stable_mosaic.version = 11 : i64} {
  func.func @attention_head_kernel(%arg0: memref<2x8x32xf32, #tpu.memory_space<vmem>>, %arg1: memref<32x24xf32, #tpu.memory_space<vmem>>, %arg2: memref<2x8x8xf32, #tpu.memory_space<vmem>>) attributes {dimension_semantics = [], scalar_prefetch = 0 : i64, scratch_operands = 0 : i64, tpu.core_type = #tpu.core_type<tc>} {
    %c0 = arith.constant 0 : index
    %c0_0 = arith.constant 0 : index
    %c0_1 = arith.constant 0 : index
    %0 = vector.load %arg0[%c0, %c0_0, %c0_1] : memref<2x8x32xf32, #tpu.memory_space<vmem>>, vector<2x8x32xf32>
    %1 = vector.shape_cast %0 : vector<2x8x32xf32> to vector<16x32xf32>
    %c0_2 = arith.constant 0 : index
    %c0_3 = arith.constant 0 : index
    %2 = vector.load %arg1[%c0_2, %c0_3] : memref<32x24xf32, #tpu.memory_space<vmem>>, vector<32x24xf32>
    %cst = arith.constant dense<0.000000e+00> : vector<16x24xf32>
    %3 = tpu.matmul %1, %2, %cst {dimension_numbers = #tpu.dot_dimension_numbers<[1], [0], [0], [1], [0, 0, 1, 1], [], []>} : vector<16x32xf32>, vector<32x24xf32>, vector<16x24xf32> -> vector<16x24xf32>
    %4 = vector.shape_cast %3 : vector<16x24xf32> to vector<2x8x24xf32>
    %5 = vector.extract_strided_slice %4 {offsets = [0, 0, 0], sizes = [2, 8, 8], strides = [1, 1, 1]} : vector<2x8x24xf32> to vector<2x8x8xf32>
    %cst_4 = arith.constant 0.176776692 : f32
    %6 = vector.broadcast %cst_4 : f32 to vector<2x8x8xf32>
    %7 = arith.mulf %5, %6 : vector<2x8x8xf32>
    %8 = vector.extract_strided_slice %4 {offsets = [0, 0, 8], sizes = [2, 8, 8], strides = [1, 1, 1]} : vector<2x8x24xf32> to vector<2x8x8xf32>
    %9 = vector.extract_strided_slice %4 {offsets = [0, 0, 16], sizes = [2, 8, 8], strides = [1, 1, 1]} : vector<2x8x24xf32> to vector<2x8x8xf32>
    "tpu.trace_start"() <{level = 10 : i32, message = "btd,bsd->bts"}> : () -> ()
    %cst_5 = arith.constant dense<0.000000e+00> : vector<2x8x8xf32>
    %10 = tpu.matmul %7, %8, %cst_5 {dimension_numbers = #tpu.dot_dimension_numbers<[2], [2], [1], [1], [0, 0, 0, 1, 1, 1], [0], [0]>} : vector<2x8x8xf32>, vector<2x8x8xf32>, vector<2x8x8xf32> -> vector<2x8x8xf32>
    "tpu.trace_stop"() : () -> ()
    %11 = tpu.iota {dimensions = array<i32: 0>} : vector<8x8xi32>
    %12 = tpu.iota {dimensions = array<i32: 1>} : vector<8x8xi32>
    %13 = arith.cmpi sge, %11, %12 : vector<8x8xi32>
    %14 = vector.shape_cast %13 : vector<8x8xi1> to vector<1x8x8xi1>
    %cst_6 = arith.constant 0xFF800000 : f32
    %15 = vector.shape_cast %14 : vector<1x8x8xi1> to vector<1x8x8xi1>
    %16 = vector.broadcast %15 : vector<1x8x8xi1> to vector<2x8x8xi1>
    %17 = vector.broadcast %cst_6 : f32 to vector<2x8x8xf32>
    %18 = arith.select %16, %10, %17 : vector<2x8x8xi1>, vector<2x8x8xf32>
    %cst_7 = arith.constant dense<0xFF800000> : vector<2x8xf32>
    %19 = vector.multi_reduction <maximumf>, %18, %cst_7 [2] : vector<2x8x8xf32> to vector<2x8xf32>
    %20 = vector.shape_cast %19 : vector<2x8xf32> to vector<2x8x1xf32>
    %21 = vector.broadcast %20 : vector<2x8x1xf32> to vector<2x8x8xf32>
    %22 = arith.subf %18, %21 : vector<2x8x8xf32>
    %23 = math.exp %22 : vector<2x8x8xf32>
    %cst_8 = arith.constant dense<0.000000e+00> : vector<2x8xf32>
    %24 = vector.multi_reduction <add>, %23, %cst_8 [2] : vector<2x8x8xf32> to vector<2x8xf32>
    %25 = vector.shape_cast %24 : vector<2x8xf32> to vector<2x8x1xf32>
    "tpu.trace_start"() <{level = 10 : i32, message = "bts,bsd->btd"}> : () -> ()
    %cst_9 = arith.constant dense<0.000000e+00> : vector<2x8x8xf32>
    %26 = tpu.matmul %23, %9, %cst_9 {dimension_numbers = #tpu.dot_dimension_numbers<[2], [1], [1], [2], [0, 0, 0, 1, 1, 2], [0], [0]>} : vector<2x8x8xf32>, vector<2x8x8xf32>, vector<2x8x8xf32> -> vector<2x8x8xf32>
    "tpu.trace_stop"() : () -> ()
    %27 = tpu.reciprocal %25 {approx = true} : vector<2x8x1xf32> -> vector<2x8x1xf32>
    %28 = vector.broadcast %27 : vector<2x8x1xf32> to vector<2x8x8xf32>
    %29 = arith.mulf %26, %28 : vector<2x8x8xf32>
    %c0_10 = arith.constant 0 : index
    %c0_11 = arith.constant 0 : index
    %c0_12 = arith.constant 0 : index
    %30 = vector.load %arg2[%c0_10, %c0_11, %c0_12] : memref<2x8x8xf32, #tpu.memory_space<vmem>>, vector<2x8x8xf32>
    tpu.vector_store %arg2[%c0_10, %c0_11, %c0_12], %29 {strides = array<i32>} : memref<2x8x8xf32, #tpu.memory_space<vmem>>, vector<2x8x8xf32>,
    return
  }
}

</mosaic_0001>

<bundles_post_ra>
// kernel: tpu_custom_call.1
= control target key start
LH: loop header
LB: loop body
LE: loop exit
PB: predicated region body
PF: predicated region fallthrough
CT: control target
= control target key end

     0   :  { %vm18_vm0 = vcmask 261120   ;;  %s630_s0 = inlined_call_operand.vmem [shape: f32[2,8,32], index: 0, kind: input, shape index: {}]   ;;  %s631_s1 = inlined_call_operand.vmem [shape: f32[32,24], index: 1, kind: input, shape index: {}]   ;;  %s632_s2 = inlined_call_operand.hbm [shape: f32[2,8,8], index: 2, kind: output, shape index: {}]  }
   0x1   :  { %v14_v0 = vld [vmem:[%s631_s1] sm:$0xff]  ;;  %v15_v1 = vld [vmem:[%s631_s1 + $0x8] sm:$0xff]  ;;  %v16_v2 = vld [vmem:[%s631_s1 + $0x10] sm:$0xff] }
   0x2   :  { %v513_v3 = vpack.c.bf16 %v15_v1, %v14_v0  ;;  %v17_v4 = vld [vmem:[%s631_s1 + $0x18] sm:$0xff]  ;;  %v12_v5 = vld [vmem:[%s630_s0] sm:$0xff] }
   0x3   :  { %v517_v6 = vpack.c.bf16 %v17_v4, %v16_v2  ;;  %490 = vmatprep.mubr.msk.f32.mxu0 %vm18_vm0, %v12_v5 }
   0x4   :  { %7 = vsyncpa [#allocation3], 0  ;;  %514 = vmatprep.subr.bf16.mxu0 %v513_v3  ;;  %v13_v7 = vld [vmem:[%s630_s0 + $0x8] sm:$0xff]  ;;  %v560_v8 = vmov 0.0   ;;  %vm561_vm1 = vmmov 0   ;;  %s562_s1 = smov 120   ;;  %v259_v16 = vlaneseq }
   0x5   :  { %516 = vmatpush3.bf16.msra.mxu0 %v513_v3  ;;  %493 = vmatprep.subr.mxu1 %v560_v8  ;;  %s563_s21 = smov 112   ;;  %vm105_vm2 = vcmask 64512   ;;  %s564_s0 = smov [#allocation2]  }
   0x6   :  { %518 = vmatprep.subr.bf16.mxu0 %v517_v6  ;;  %495 = vmatprep.mubr.msk.f32.mxu1 %vm561_vm1, %v560_v8  ;;  %v260_v17 = vshrl.u32 %v259_v16, 7  ;;  %v262_v18 = vand.u32 127, %v259_v16  ;;  %s449_s22 = sshll.u32 %s564_s0, 4  ;;  %s450_s22 = int_to_ptr.vmem [resolvable:$true] %s449_s22 }
   0x7   :  { %s536_s23 = scalar_lea.vmem %s450_s22, 256  ;;  %p541_p1 = scmp.lt.s32.totalorder %s450_s22, %s450_s22 }
   0x8   :  { %vm263_vm3 = vcmp.ge.s32.totalorder %v260_v17, %v262_v18  ;;  %p537_p0 = scmp.ne.s32.totalorder %s450_s22, %s536_s23  ;;  %p542_p2 = scmp.lt.s32.totalorder %s536_s23, %s536_s23 }
   0x9   :  { %520 = vmatpush3.bf16.msra.mxu0 %v517_v6 }
   0xa   :  { %503 = vmatprep.subr.mxu0 %v560_v8  ;;  %p543_p3 = por %p542_p2, %p541_p1 }
   0xc   :  { %491 = vmatmul.mubr.msk.f32.vlgmr.msra.gmra.mrb[0].mxu0 %vm18_vm0, %v13_v7  ;;  %p544_p4 = pnand %p543_p3, %p537_p0 }
   0xd   :  { %505 = vmatprep.mubr.msk.f32.mxu0 %vm561_vm1, %v560_v8 }
  0xdf   :  { %v492_v9 = vpop.f32.mrb[0].mxu0 }
  0xe0   :  { %v91_v10 = vpop.f32.mrb[1].mxu0  ;;  %v101_v14 = vmul.f32 0.17677669, %v492_v9 }
  0xe1   :  { %103 = vrot.lane.b32.xlu0 %v91_v10, %s562_s1  ;;  %v100_v12 = vmul.f32 0.17677669, %v91_v10 }
  0xe5   :  { %182 = vrot.lane.b32.xlu0 %v492_v9, %s562_s1 }
  0xe9   :  { %286 = vrot.lane.b32.xlu0 %v91_v10, %s563_s21 }
 0x153   :  { %v104_v11 = vpop.permute.xlu0 %103 }
 0x154   :  { %494 = vmatpush3.xpose.msk.msra.mxu1 %vm105_vm2, %v104_v11 }
 0x155   :  { %498 = vmatprep.subr.mxu1 %v560_v8 }
 0x157   :  { %v183_v13 = vpop.permute.xlu0 %182  ;;  %496 = vmatmul.mubr.msk.f32.vlgmr.msra.gmra.mrb[0].mxu1 %vm105_vm2, %v100_v12 }
 0x158   :  { %499 = vmatpush3.xpose.msk.msra.mxu1 %vm105_vm2, %v183_v13  ;;  %500 = vmatprep.mubr.msk.f32.mxu1 %vm561_vm1, %v560_v8 }
 0x159   :  { %508 = vmatprep.subr.mxu1 %v560_v8 }
 0x15b   :  { %v287_v15 = vpop.permute.xlu0 %286  ;;  %501 = vmatmul.mubr.msk.f32.vlgmr.msra.gmra.mrb[2].mxu1 %vm105_vm2, %v101_v14 }
 0x15c   :  { %504 = vmatpush3.msra.mxu0 %v287_v15  ;;  %510 = vmatprep.mubr.msk.f32.mxu1 %vm561_vm1, %v560_v8 }
 0x22a   :  { %v177_v19 = vpop.f32.mrb[0].mxu1 }
 0x22b   :  { %v266_v20 = vsel %vm263_vm3, %v177_v19, -inf  ;;  %v497_v21 = vpop.f32.mrb[1].mxu1 }
 0x22c   :  { %v268_v22 = vsel %vm105_vm2, %v266_v20, -inf }
 0x22d   :  { %269 = vmax.xlane.f32.xlu1 %v268_v22 }
 0x22e   :  { %v255_v23 = vpop.f32.mrb[2].mxu1 }
 0x22f   :  { %v267_v24 = vsel %vm263_vm3, %v255_v23, -inf  ;;  %v502_v25 = vpop.f32.mrb[3].mxu1 }
 0x230   :  { %v271_v26 = vsel %vm105_vm2, %v267_v24, -inf }
 0x231   :  { %272 = vmax.xlane.f32.xlu1 %v271_v26 }
 0x242   :  { %362 = vrot.lane.b32.xlu1 %v492_v9, %s563_s21 }
 0x2ba   :  { %v270_v27 = vpop.xlane.xlu1 %269 }
 0x2bb   :  { %v274_v28 = vsub.f32 %v266_v20, %v270_v27 }
 0x2bd   :  { %v276_v29 = vmul.f32 1.442695, %v274_v28 }
 0x2be   :  { %v273_v30 = vpop.xlane.xlu1 %272 }
 0x2bf   :  { %528 = vpow2.f32 %v276_v29  ;;  %v275_v31 = vsub.f32 %v267_v24, %v273_v30 }
 0x2c1   :  { %v278_v32 = vmul.f32 1.442695, %v275_v31 }
 0x2c2   :  { %v363_v33 = vpop.permute.xlu1 %362 }
 0x2c3   :  { %530 = vpow2.f32 %v278_v32  ;;  %509 = vmatpush3.msra.mxu1 %v363_v33 }
 0x2c9   :  { %v529_v34 = vpop.eup %528 }
 0x2ca   :  { %506 = vmatmul.mubr.msk.f32.vlgmr.msra.gmra.mrb[2].mxu0 %vm105_vm2, %v529_v34  ;;  %v280_v35 = vsel %vm105_vm2, %v529_v34, 0.0 }
 0x2cb   :  { %281 = vadd.xlane.f32.xlu0 %v280_v35 }
 0x2cd   :  { %v531_v36 = vpop.eup %530 }
 0x2ce   :  { %511 = vmatmul.mubr.msk.f32.vlgmr.msra.gmra.mrb[4].mxu1 %vm105_vm2, %v531_v36  ;;  %v283_v37 = vsel %vm105_vm2, %v531_v36, 0.0 }
 0x2cf   :  { %284 = vadd.xlane.f32.xlu1 %v283_v37 }
 0x358   :  { %v282_v38 = vpop.xlane.xlu0 %281 }
 0x359   :  { %532 = vrcp.f32 %v282_v38 }
 0x35c   :  { %v285_v39 = vpop.xlane.xlu1 %284 }
 0x35d   :  { %534 = vrcp.f32 %v285_v39 }
 0x363   :  { %v533_v40 = vpop.eup %532 }
 0x367   :  { %v535_v44 = vpop.eup %534 }
 0x39d   :  { %v358_v41 = vpop.f32.mrb[2].mxu0 }
 0x39e   :  { %v440_v42 = vmul.f32 %v533_v40, %v358_v41  ;;  %v507_v43 = vpop.f32.mrb[3].mxu0 }
 0x3a0   :  { %442 = vst.msk [vmem:[#allocation2] sm:$0xff] %vm105_vm2, %v440_v42 }
 0x3a1   :  { %v434_v45 = vpop.f32.mrb[4].mxu1 }
 0x3a2   :  { %v441_v46 = vmul.f32 %v535_v44, %v434_v45  ;;  %v512_v47 = vpop.f32.mrb[5].mxu1 }
 0x3a4   :  { %443 = vst.msk [vmem:[#allocation2 + $0x8] sm:$0xff] %vm105_vm2, %v441_v46 }
 0x3a5   :  { %547 = shalt.err (!%p544_p4)
}
 0x3a6   :  { %s548_s26 = scalar_lea.hbm %s632_s2, 256 }
 0x3a7   :  { %p549_p5 = scmp.ne.s32.totalorder %s632_s2, %s548_s26  ;;  %p552_p6 = scmp.lt.u32.totalorder %s548_s26, %s632_s2 }
 0x3a9   :  { %p554_p7 = pnand %p552_p6, %p549_p5 }
 0x3ab   :  { %557 = shalt.err (!%p554_p7)
}
 0x3ac   :  { %s565_s3 = smov 128   ;;  %s566_s4 = smov 8  }
 0x3ad   :  { %455 = dma.vmem_to_hbm [thread:$0]  %s450_s22, 256, %s632_s2, [#allocation3], %s565_s3, %s565_s3, %s566_s4  }
 0x3ae   :  { %558 = dma.done.wait [#allocation3], 256  }
 0x3af   :  { %559 = vsyncadd [#allocation3], 4294967040 }
 0x3b0   :  { %459 = vsyncpa [#allocation3], 1 }

</bundles_post_ra>
